<compile_context>
chip_gen: v7x
topology: tpu7x:2x2x1
jax: 0.10.0
libtpu: 0.0.40
codegen_flags: <defaults>
</compile_context>

<pallas_src>
import jax
import jax.numpy as jnp
from jax.experimental import pallas as pl
from jax.experimental.pallas import tpu as pltpu

LANES = 128                       # batch elements packed per row
TR_CAP = 4096                     # max rows per grid step (~12 MiB working set at d=2)
_VMEM_LIMIT_BYTES = 32 * 1024 * 1024


def _make_kernel(tile_rows, total_rows):
    needs_mask = (total_rows % tile_rows) != 0

    def kernel(x_ref, w_ref, o_ref):
        # x_ref: (tile_rows, 128*d) f32   -- 128 batch elems/row, features on lanes
        # w_ref: (128*d, 128)      f32   -- de-interleave + collapsed matvec weight
        # o_ref: (tile_rows, 128)  f32
        x = x_ref[...]
        if needs_mask:
            # Last grid block may read past the array end; zero those rows so
            # garbage (possibly NaN) cannot leak into valid output lanes via
            # the matmul reduction.
            row = (jax.lax.broadcasted_iota(jnp.int32, x.shape, 0)
                   + pl.program_id(0) * tile_rows)
            x = jnp.where(row < total_rows, x, 0.0)
        q = jnp.dot(x, w_ref[...], preferred_element_type=jnp.float32)
        o_ref[...] = jnp.tanh(jnp.tanh(q))   # double tanh, per PyTorch spec

    return kernel


def committor_net_forward(x, w1, w2, d, *, min_pallas_batch=4096):
    """CommittorNet.forward.

    x:  any shape flattenable to (-1, d)
    w1: (n, d) lin1 weight (no bias);  w2: (1, n) lin2 weight (no bias)
    Returns (B,) float32.
    """
    # TODO(synk): optional `thresh` callable (None by default) not implemented.
    x2 = jnp.reshape(x, (-1, d)).astype(jnp.float32)            # natural (B, d)
    B = x2.shape[0]

    # Collapse the two bias-free linears: lin2(lin1(x)) == x @ (W2 @ W1).T
    weff = (w2.astype(jnp.float32) @ w1.astype(jnp.float32)).reshape(d)

    # Tiny batches: fixed kernel-launch/DMA-setup cost dominates -> plain XLA.
    if B <= min_pallas_batch:
        return jnp.tanh(jnp.tanh(x2 @ weff))

    # Pack 128 batch elements per row (features interleaved on lanes).  This
    # reshape of a row-major array is free; only a real pad copy happens if B
    # is not already a multiple of 128 (padded entries are exact zeros).
    B1 = pl.cdiv(B, LANES) * LANES
    if B1 != B:
        x2 = jnp.pad(x2, ((0, B1 - B), (0, 0)))
    rows = B1 // LANES
    xr = jnp.reshape(x2, (rows, LANES * d))

    # De-interleave + matvec as one sparse-pattern matmul weight:
    #   out[r, k] = sum_f weff[f] * x[r*128 + k, f]
    j = jnp.arange(LANES * d)
    w_gather = (weff[j % d][:, None]
                * (j[:, None] // d == jnp.arange(LANES)[None, :])).astype(jnp.float32)

    # Row tile: as big as the VMEM budget allows, but keep >= 2 grid steps when
    # there is enough work so v7x megacore can split the batch axis.
    if rows > TR_CAP:
        tile_rows = TR_CAP
    elif rows > 8:
        tile_rows = min(TR_CAP, (((rows + 1) // 2) + 7) // 8 * 8)
    else:
        tile_rows = rows
    grid = pl.cdiv(rows, tile_rows)

    out = pl.pallas_call(
        _make_kernel(tile_rows, rows),
        out_shape=jax.ShapeDtypeStruct((rows, LANES), jnp.float32),
        grid=(grid,),
        in_specs=[
            pl.BlockSpec((tile_rows, LANES * d), lambda i: (i, 0)),
            # constant block index -> stays resident across grid steps
            pl.BlockSpec((LANES * d, LANES), lambda i: (0, 0)),
        ],
        out_specs=pl.BlockSpec((tile_rows, LANES), lambda i: (i, 0)),
        compiler_params=pltpu.CompilerParams(
            dimension_semantics=("parallel",),       # batch axis, no carry
            vmem_limit_bytes=_VMEM_LIMIT_BYTES,
        ),
    )(xr, w_gather)

    return jnp.reshape(out, (B1,))[:B]


def init_params(key, d, n):
    """Deterministic init mirroring CommittorNet.__init__ / initialize('meanfield')."""
    k1, k2 = jax.random.split(key)
    w1 = jax.random.normal(k1, (n, d), dtype=jnp.float32)
    w1 = w1 / jnp.linalg.norm(w1, axis=1, keepdims=True)        # renormalize rows
    w2 = jax.random.normal(k2, (1, n), dtype=jnp.float32) / n    # meanfield
    return w1, w2


if __name__ == "__main__":
    d, n = 2, 32   # Mueller_System implies d = 2

    key = jax.random.PRNGKey(0)
    kx, kp = jax.random.split(key)
    w1, w2 = init_params(kp, d, n)

    fwd = jax.jit(committor_net_forward, static_argnames=("d", "min_pallas_batch"))

    def ref(xin):
        x2 = jnp.reshape(xin, (-1, d)).astype(jnp.float32)
        return jnp.tanh(jnp.tanh((x2 @ w1.T) @ w2.T)).reshape(-1)

    # 1) Pallas path, exact tiling (B multiple of 128, 2 grid steps).
    xa = jax.random.normal(kx, (8192, d), dtype=jnp.float32)
    out_a = jax.block_until_ready(fwd(xa, w1, w2, d=d, min_pallas_batch=4096))
    assert out_a.shape == (8192,)
    assert jnp.allclose(out_a, ref(xa), atol=1e-5, rtol=1e-5)

    # 2) Pallas path with a partial (in-kernel masked) last grid block.
    xb = jax.random.normal(jax.random.PRNGKey(1), (9344, d), dtype=jnp.float32)
    out_b = jax.block_until_ready(fwd(xb, w1, w2, d=d, min_pallas_batch=4096))
    assert jnp.allclose(out_b, ref(xb), atol=1e-5, rtol=1e-5)

    # 3) Pallas path with B not a multiple of 128 (zero pad + slice), forced.
    xc = jax.random.normal(jax.random.PRNGKey(2), (1000, d), dtype=jnp.float32)
    out_c = jax.block_until_ready(fwd(xc, w1, w2, d=d, min_pallas_batch=0))
    assert jnp.allclose(out_c, ref(xc), atol=1e-5, rtol=1e-5)

    # 4) Tiny batch: plain-XLA fallback (no pallas launch, no tile padding).
    xd = jax.random.normal(jax.random.PRNGKey(3), (16, d), dtype=jnp.float32)
    out_d = jax.block_until_ready(fwd(xd, w1, w2, d=d, min_pallas_batch=4096))
    assert out_d.shape == (16,)
    assert jnp.allclose(out_d, ref(xd), atol=1e-5, rtol=1e-5)

    print("KERNEL_OK")
</pallas_src>

<mosaic_0001>
module attributes {stable_mosaic.version = 11 : i64} {
  func.func @kernel(%arg0: i32, %arg1: memref<32x256xf32, #tpu.memory_space<vmem>>, %arg2: memref<256x128xf32, #tpu.memory_space<vmem>>, %arg3: memref<32x128xf32, #tpu.memory_space<vmem>>) attributes {dimension_semantics = [#tpu.dimension_semantics<parallel>], iteration_bounds = array<i64: 2>, scalar_prefetch = 0 : i64, scratch_operands = 0 : i64, tpu.core_type = #tpu.core_type<tc>, window_params = [{transform_indices = @transform_0, window_bounds = array<i64: 32, 256>}, {pipeline_mode = #tpu.pipeline_mode<synchronous>, transform_indices = @transform_1, window_bounds = array<i64: 256, 128>}, {transform_indices = @transform_2, window_bounds = array<i64: 32, 128>}]} {
    %c0 = arith.constant 0 : index
    %c0_0 = arith.constant 0 : index
    %0 = vector.load %arg1[%c0, %c0_0] : memref<32x256xf32, #tpu.memory_space<vmem>>, vector<32x256xf32>
    %c0_1 = arith.constant 0 : index
    %c0_2 = arith.constant 0 : index
    %1 = vector.load %arg2[%c0_1, %c0_2] : memref<256x128xf32, #tpu.memory_space<vmem>>, vector<256x128xf32>
    %cst = arith.constant dense<0.000000e+00> : vector<32x128xf32>
    %2 = tpu.matmul %0, %1, %cst {dimension_numbers = #tpu.dot_dimension_numbers<[1], [0], [0], [1], [0, 0, 1, 1], [], []>} : vector<32x256xf32>, vector<256x128xf32>, vector<32x128xf32> -> vector<32x128xf32>
    %3 = math.tanh %2 : vector<32x128xf32>
    %4 = math.tanh %3 : vector<32x128xf32>
    %c0_3 = arith.constant 0 : index
    %c0_4 = arith.constant 0 : index
    %5 = vector.load %arg3[%c0_3, %c0_4] : memref<32x128xf32, #tpu.memory_space<vmem>>, vector<32x128xf32>
    tpu.vector_store %arg3[%c0_3, %c0_4], %4 {strides = array<i32>} : memref<32x128xf32, #tpu.memory_space<vmem>>, vector<32x128xf32>,
    return
  }
  func.func @transform_0(%arg0: i32) -> (i32, i32) {
    %c0_i32 = arith.constant 0 : i32
    %c0_i32_0 = arith.constant 0 : i32
    return %arg0, %c0_i32 : i32, i32
  }
  func.func @transform_1(%arg0: i32) -> (i32, i32) {
    %c0_i32 = arith.constant 0 : i32
    %c0_i32_0 = arith.constant 0 : i32
    %c0_i32_1 = arith.constant 0 : i32
    return %c0_i32, %c0_i32_0 : i32, i32
  }
  func.func @transform_2(%arg0: i32) -> (i32, i32) {
    %c0_i32 = arith.constant 0 : i32
    %c0_i32_0 = arith.constant 0 : i32
    return %arg0, %c0_i32 : i32, i32
  }
}

</mosaic_0001>

<bundles_post_ra>
// kernel: committor_net_forward.1
= control target key start
LH: loop header
LB: loop body
LE: loop exit
PB: predicated region body
PF: predicated region fallthrough
CT: control target
= control target key end

     0   :  { %7 = vsyncpa [#allocation3], 0  ;;  %s815_s0 = inlined_call_operand.vmem [shape: f32[64,256], index: 0, kind: input, shape index: {}]   ;;  %s816_s1 = inlined_call_operand.vmem [shape: f32[256,128], index: 1, kind: input, shape index: {}]   ;;  %s817_s2 = inlined_call_operand.hbm [shape: f32[64,128], index: 2, kind: output, shape index: {}]  }
   0x1   :  { %9 = vsyncpa [#allocation3 + $0x1], 0  ;;  %s607_s9 = smov 0   ;;  %s609_s10 = smov 0  }
   0x2   :  { %s611_s11 = smov 0   ;;  %s613_s12 = smov 0  }
   0x3 LB: > { %s628_s13 = sadd.s32 4294967295, %s587_s12   ;;  %s361_s14 = sadd.s32 4294967294, %s587_s12   ;;  %s587_s12 = sphi %s613_s12, %s823_s12   ;;  %s583_s11 = sphi %s611_s11, %s822_s11   ;;  %s579_s10 = sphi %s609_s10, %s821_s10   ;;  %s575_s9 = sphi %s607_s9, %s820_s9  }
   0x4   : > { %s632_s15 = sadd.s32 1, %s587_s12   ;;  %s69_s16 = sadd.s32 1, %s583_s11 }
   0x5   : > { %s66_s17 = ssub.s32 %s587_s12, %s632_s15  ;;  %p79_p0 = scmp.ne.s32.totalorder %s583_s11, %s579_s10 }
   0x6   : > { %p67_p1 = scmp.eq.s32.totalorder %s66_s17, 0  ;;  %p80_p2 = scmp.eq.s32.totalorder %s628_s13, 1 }
   0x7   : > { %p85_p3 = scmp.ne.s32.totalorder %s579_s10, %s575_s9  ;;  %p86_p4 = scmp.eq.s32.totalorder %s361_s14, 1 }
   0x8   : > { %s643_s18 = scalar_select %p67_p1, %s583_s11, %s69_s16  }
   0x9   : > { %p645_p5 = por %p80_p2, %p79_p0  ;;  %p649_p6 = por %p86_p4, %p85_p3 }
   0xa   : > { %p364_p7 = scmp.ge.s32.totalorder %s587_s12, 1  ;;  %p117_p8 = scmp.lt.s32.totalorder %s587_s12, 3 }
   0xc   : > { %p118_p9 = pnand %p364_p7, %p117_p8 }
   0xd   : > { %v172_v0 = vld [vmem:[%s816_s1 + $0x80] sm:$0xff] (!%p118_p9)  ;;  %v173_v1 = vld [vmem:[%s816_s1 + $0x88] sm:$0xff] (!%p118_p9)  ;;  %s366_s27 = sshll.u32 (!%p118_p9), %s628_s13, 2  ;;  %v174_v5 = vld [vmem:[%s816_s1 + $0x90] sm:$0xff] (!%p118_p9)  ;;  %s375_s8 = sshll.u32 (!%p118_p9), %s628_s13, 9 }
   0xe   : > { %121 = sbr.rel (%p118_p9) target bundleno = 305 (0x131), region = 28  ;;  %v156_v2 = vld [vmem:[%s816_s1] sm:$0xff] (!%p118_p9)  ;;  %v420_v3 = vpack.c.bf16 (!%p118_p9), %v173_v1, %v172_v0  ;;  %v157_v4 = vld [vmem:[%s816_s1 + $0x8] sm:$0xff] (!%p118_p9)  ;;  %v175_v6 = vld [vmem:[%s816_s1 + $0x98] sm:$0xff] (!%p118_p9)  ;;  %p141_p10 = scmp.lt.s32.totalorder (!%p118_p9), %s366_s27, 7 }
   0xf   : > { %v422_v7 = vpack.c.bf16 (!%p118_p9), %v157_v4, %v156_v2  ;;  %v424_v8 = vpack.c.bf16 (!%p118_p9), %v175_v6, %v174_v5  ;;  %v158_v9 = vld [vmem:[%s816_s1 + $0x10] sm:$0xff] (!%p118_p9)  ;;  %v159_v10 = vld [vmem:[%s816_s1 + $0x18] sm:$0xff] (!%p118_p9)  ;;  %v176_v11 = vld [vmem:[%s816_s1 + $0xa0] sm:$0xff] (!%p118_p9)  ;;  %s770_s22 = scalar_lea.hbm (!%p118_p9), %s817_s2, %s375_s8  ;;  %s589_s24 = smov (!%p118_p9), [#allocation2]  }
  0x10   : > { %421 = vmatprep.subr.bf16.mxu0 (!%p118_p9), %v420_v3  ;;  %452 = vmatprep.subr.bf16.mxu1 (!%p118_p9), %v420_v3  ;;  %v177_v12 = vld [vmem:[%s816_s1 + $0xa8] sm:$0xff] (!%p118_p9)  ;;  %v426_v13 = vpack.c.bf16 (!%p118_p9), %v159_v10, %v158_v9  ;;  %v160_v15 = vld [vmem:[%s816_s1 + $0x20] sm:$0xff] (!%p118_p9)  ;;  %v178_v17 = vld [vmem:[%s816_s1 + $0xb0] sm:$0xff] (!%p118_p9)  ;;  %s529_s25 = sshll.u32 (!%p118_p9), %s589_s24, 4  ;;  %s530_s25 = int_to_ptr.vmem [resolvable:$false] %s529_s25 }
  0x11   : > { %423 = vmatpush3.bf16.msra.mxu0 (!%p118_p9), %v422_v7  ;;  %460 = vmatpush3.bf16.msra.mxu1 (!%p118_p9), %v422_v7  ;;  %v428_v14 = vpack.c.bf16 (!%p118_p9), %v177_v12, %v176_v11  ;;  %v161_v16 = vld [vmem:[%s816_s1 + $0x28] sm:$0xff] (!%p118_p9)  ;;  %v179_v18 = vld [vmem:[%s816_s1 + $0xb8] sm:$0xff] (!%p118_p9)  ;;  %v162_v21 = vld [vmem:[%s816_s1 + $0x30] sm:$0xff] (!%p118_p9)  ;;  %s531_s26 = scalar_lea.vmem (!%p118_p9), %s530_s25, 1024 }
  0x12   : > { %425 = vmatprep.subr.bf16.mxu0 (!%p118_p9), %v424_v8  ;;  %453 = vmatprep.subr.bf16.mxu1 (!%p118_p9), %v424_v8  ;;  %v430_v19 = vpack.c.bf16 (!%p118_p9), %v161_v16, %v160_v15  ;;  %v432_v20 = vpack.c.bf16 (!%p118_p9), %v179_v18, %v178_v17  ;;  %v163_v22 = vld [vmem:[%s816_s1 + $0x38] sm:$0xff] (!%p118_p9)  ;;  %v180_v23 = vld [vmem:[%s816_s1 + $0xc0] sm:$0xff] (!%p118_p9)  ;;  %v181_v24 = vld [vmem:[%s816_s1 + $0xc8] sm:$0xff] (!%p118_p9) }
  0x13   : > { %v434_v27 = vpack.c.bf16 (!%p118_p9), %v163_v22, %v162_v21  ;;  %v436_v28 = vpack.c.bf16 (!%p118_p9), %v181_v24, %v180_v23  ;;  %v164_v29 = vld [vmem:[%s816_s1 + $0x40] sm:$0xff] (!%p118_p9)  ;;  %v165_v30 = vld [vmem:[%s816_s1 + $0x48] sm:$0xff] (!%p118_p9)  ;;  %v182_v31 = vld [vmem:[%s816_s1 + $0xd0] sm:$0xff] (!%p118_p9) }
  0x14   : > { %v183_v32 = vld [vmem:[%s816_s1 + $0xd8] sm:$0xff] (!%p118_p9)  ;;  %v438_v33 = vpack.c.bf16 (!%p118_p9), %v165_v30, %v164_v29  ;;  %v166_v35 = vld [vmem:[%s816_s1 + $0x50] sm:$0xff] (!%p118_p9)  ;;  %v184_v37 = vld [vmem:[%s816_s1 + $0xe0] sm:$0xff] (!%p118_p9) }
  0x15   : > { %s825_s27 = smov (!%p141_p10, %s366_s27), 7  ;;  %427 = vmatpush3.bf16.msra.mxu0 %v426_v13  ;;  %461 = vmatpush3.bf16.msra.mxu1 %v426_v13  ;;  %v440_v34 = vpack.c.bf16 %v183_v32, %v182_v31  ;;  %v167_v36 = vld [vmem:[%s816_s1 + $0x58] sm:$0xff]  ;;  %v185_v38 = vld [vmem:[%s816_s1 + $0xe8] sm:$0xff]  ;;  %v168_v41 = vld [vmem:[%s816_s1 + $0x60] sm:$0xff] }
  0x16   : > { %s374_s28 = sshll.u32 %s825_s27, 4  ;;  %429 = vmatprep.subr.bf16.mxu0 %v428_v14  ;;  %454 = vmatprep.subr.bf16.mxu1 %v428_v14  ;;  %v442_v39 = vpack.c.bf16 %v167_v36, %v166_v35  ;;  %v444_v40 = vpack.c.bf16 %v185_v38, %v184_v37  ;;  %v169_v42 = vld [vmem:[%s816_s1 + $0x68] sm:$0xff]  ;;  %v186_v43 = vld [vmem:[%s816_s1 + $0xf0] sm:$0xff]  ;;  %v187_v44 = vld [vmem:[%s816_s1 + $0xf8] sm:$0xff] }
  0x17   : > { %s701_s7 = scalar_lea.vmem %s815_s0, %s374_s28  ;;  %v446_v45 = vpack.c.bf16 %v169_v42, %v168_v41  ;;  %v448_v46 = vpack.c.bf16 %v187_v44, %v186_v43  ;;  %v170_v47 = vld [vmem:[%s816_s1 + $0x70] sm:$0xff]  ;;  %v171_v48 = vld [vmem:[%s816_s1 + $0x78] sm:$0xff] }
  0x18   : > { %v149_v25 = vld [vmem:[%s701_s7 + $0x8] sm:$0xff]  ;;  %v450_v49 = vpack.c.bf16 %v171_v48, %v170_v47  ;;  %v148_v50 = vld [vmem:[%s701_s7] sm:$0xff]  ;;  %v151_v52 = vld [vmem:[%s701_s7 + $0x18] sm:$0xff] }
  0x19   : > { %252 = vmatprep.mubr.f32.mxu0 %v149_v25  ;;  %v153_v26 = vld [vmem:[%s701_s7 + $0x28] sm:$0xff]  ;;  %431 = vmatpush3.bf16.msra.mxu0 %v430_v19  ;;  %v152_v51 = vld [vmem:[%s701_s7 + $0x20] sm:$0xff]  ;;  %v155_v53 = vld [vmem:[%s701_s7 + $0x38] sm:$0xff] }
  0x1a   : > { %462 = vmatpush3.bf16.msra.mxu1 %v430_v19  ;;  %433 = vmatprep.subr.bf16.mxu0 %v432_v20  ;;  %v150_v54 = vld [vmem:[%s701_s7 + $0x10] sm:$0xff] }
  0x1b   : > { %455 = vmatprep.subr.bf16.mxu1 %v432_v20  ;;  %262 = vmatprep.mubr.f32.mxu1 %v153_v26  ;;  %v154_v55 = vld [vmem:[%s701_s7 + $0x30] sm:$0xff]  ;;  %s137_s7 = sand.u32 1, %s579_s10  }
  0x1c   : > { %s365_s27 = sshll.u32 %s137_s7, 5  ;;  %s774_s13 = scalar_lea.sflag [#allocation3], %s137_s7 }
  0x1d   : > { %435 = vmatpush3.bf16.msra.mxu0 %v434_v27  ;;  %s139_s14 = scalar_lea.vmem [#allocation2], %s365_s27 }
  0x1e   : > { %463 = vmatpush3.bf16.msra.mxu1 %v434_v27  ;;  %437 = vmatprep.subr.bf16.mxu0 %v436_v28  ;;  %s299_s16 = sshll.u32 %s139_s14, 4  ;;  %s772_s16 = int_to_ptr.vmem [resolvable:$true] %s299_s16 }
  0x1f   : > { %456 = vmatprep.subr.bf16.mxu1 %v436_v28  ;;  %s525_s23 = scalar_lea.vmem %s772_s16, 512  ;;  %p532_p0 = scmp.lt.s32.totalorder %s772_s16, %s530_s25 }
  0x20   : > { %p526_p11 = scmp.ne.s32.totalorder %s772_s16, %s525_s23  ;;  %p533_p1 = scmp.lt.s32.totalorder %s531_s26, %s525_s23 }
  0x21   : > { %439 = vmatpush3.bf16.msra.mxu0 %v438_v33 }
  0x22   : > { %464 = vmatpush3.bf16.msra.mxu1 %v438_v33  ;;  %441 = vmatprep.subr.bf16.mxu0 %v440_v34  ;;  %p527_p12 = pnand %p526_p11, %p645_p5  ;;  %p534_p2 = por %p533_p1, %p532_p0 }
  0x23   : > { %457 = vmatprep.subr.bf16.mxu1 %v440_v34 }
  0x24   : > { %p528_p13 = pneg %p527_p12 }
  0x25   : > { %443 = vmatpush3.bf16.msra.mxu0 %v442_v39 }
  0x26   : > { %465 = vmatpush3.bf16.msra.mxu1 %v442_v39  ;;  %445 = vmatprep.subr.bf16.mxu0 %v444_v40  ;;  %p535_p3 = pnand %p534_p2, %p528_p13 }
  0x27   : > { %458 = vmatprep.subr.bf16.mxu1 %v444_v40 }
  0x29   : > { %447 = vmatpush3.bf16.msra.mxu0 %v446_v45 }
  0x2a   : > { %466 = vmatpush3.bf16.msra.mxu1 %v446_v45  ;;  %449 = vmatprep.subr.bf16.mxu0 %v448_v46 }
  0x2b   : > { %459 = vmatprep.subr.bf16.mxu1 %v448_v46 }
  0x2d   : > { %451 = vmatpush3.bf16.msra.mxu0 %v450_v49 }
  0x2e   : > { %467 = vmatpush3.bf16.msra.mxu1 %v450_v49 }
  0x30   : > { %253 = vmatmul.mubr.f32.vlgmr.msra.gmra.mrb[0].mxu0 %v148_v50 }
  0x31   : > { %263 = vmatmul.mubr.f32.vlgmr.msra.gmra.mrb[0].mxu1 %v152_v51  ;;  %257 = vmatprep.mubr.f32.mxu0 %v151_v52 }
  0x32   : > { %267 = vmatprep.mubr.f32.mxu1 %v155_v53 }
  0x34   : > { %258 = vmatmul.mubr.f32.gmra.mrb[2].mxu0 %v150_v54 }
  0x35   : > { %268 = vmatmul.mubr.f32.gmra.mrb[2].mxu1 %v154_v55 }
 0x103   : > { %v408_v56 = vpop.f32.mrb[0].mxu0 }
 0x104   : > { %v414_v57 = vpop.f32.mrb[0].mxu1  ;;  %v409_v58 = vpop.f32.mrb[1].mxu0 }
 0x105   : > { %v415_v59 = vpop.f32.mrb[1].mxu1  ;;  %v410_v60 = vadd.f32 %v409_v58, %v408_v56 }
 0x106   : > { %v416_v61 = vadd.f32 %v415_v59, %v414_v57 }
 0x107   : > { %509 = vtanh.f32 %v410_v60  ;;  %v411_v62 = vpop.f32.mrb[2].mxu0 }
 0x108   : > { %v417_v63 = vpop.f32.mrb[2].mxu1  ;;  %511 = vtanh.f32 %v416_v61  ;;  %v412_v0 = vpop.f32.mrb[3].mxu0 }
 0x109   : > { %v418_v1 = vpop.f32.mrb[3].mxu1  ;;  %v413_v2 = vadd.f32 %v412_v0, %v411_v62 }
 0x10a   : > { %v419_v3 = vadd.f32 %v418_v1, %v417_v63 }
 0x10b   : > { %513 = vtanh.f32 %v413_v2 }
 0x10c   : > { %515 = vtanh.f32 %v419_v3 }
 0x111   : > { %v510_v4 = vpop.eup %509 }
 0x112   : > { %v512_v5 = vpop.eup %511  ;;  %517 = vtanh.f32 %v510_v4 }
 0x113   : > { %519 = vtanh.f32 %v512_v5 }
 0x115   : > { %v514_v6 = vpop.eup %513 }
 0x116   : > { %v516_v7 = vpop.eup %515  ;;  %521 = vtanh.f32 %v514_v6 }
 0x117   : > { %523 = vtanh.f32 %v516_v7 }
 0x11c   : > { %v518_v8 = vpop.eup %517 }
 0x11d   : > { %v520_v9 = vpop.eup %519  ;;  %281 = vst [vmem:[%s139_s14] sm:$0xff] %v518_v8 }
 0x11e   : > { %283 = vst [vmem:[%s139_s14 + $0x10] sm:$0xff] %v520_v9 }
 0x120   : > { %v522_v10 = vpop.eup %521 }
 0x121   : > { %v524_v11 = vpop.eup %523  ;;  %282 = vst [vmem:[%s139_s14 + $0x8] sm:$0xff] %v522_v10 }
 0x122   : > { %284 = vst [vmem:[%s139_s14 + $0x18] sm:$0xff] %v524_v11 }
 0x123   : > { %538 = shalt.err (!%p535_p3)
}
 0x124   : > { %s539_s28 = scalar_lea.hbm %s770_s22, 512  ;;  %s543_s3 = scalar_lea.hbm %s817_s2, 1024 }
 0x125   : > { %p540_p4 = scmp.ne.s32.totalorder %s770_s22, %s539_s28  ;;  %p544_p9 = scmp.lt.u32.totalorder %s770_s22, %s817_s2 }
 0x126   : > { %p545_p10 = scmp.lt.u32.totalorder %s543_s3, %s539_s28  ;;  %p547_p12 = scmp.lt.u32.totalorder %s539_s28, %s770_s22 }
 0x127   : > { %p541_p7 = pnand %p540_p4, %p645_p5 }
 0x128   : > { %p546_p11 = por %p545_p10, %p544_p9 }
 0x129   : > { %p542_p8 = pneg %p541_p7 }
 0x12a   : > { %p548_p13 = por %p547_p12, %p546_p11 }
 0x12c   : > { %p549_p0 = pnand %p548_p13, %p542_p8 }
 0x12e   : > { %552 = shalt.err (!%p549_p0)
}
 0x12f   : > { %s590_s6 = smov 128   ;;  %s591_s7 = smov 8  }
 0x130   : > { %468 = dma.vmem_to_hbm [thread:$0]  (%p645_p5), %s772_s16, 512, %s770_s22, %s774_s13, %s590_s6, %s590_s6, %s591_s7  }
 0x131 PF: > { %p474_p1 = scmp.ge.s32.totalorder %s587_s12, 2  ;;  %s314_s27 = sand.u32 1, %s575_s9  }
 0x132   : > { %s315_s8 = scalar_lea.sflag [#allocation3], %s314_s27 }
 0x133   : > { %p471_p2 = pnand %p474_p1, %p649_p6 }
 0x135   : > { %570 = dma.done.wait (!%p471_p2), %s315_s8, 512  }
 0x136   : > { %572 = vsyncadd (!%p471_p2), %s315_s8, 4294966784  ;;  %p12_p3 = scmp.ge.s32.totalorder %s632_s15, 4   ;;  %s820_s9 = smov %s579_s10 }
 0x137   : > { %s821_s10 = smov %s583_s11  ;;  %s822_s11 = smov %s643_s18 }
 0x138   : > { %s823_s12 = smov %s632_s15  ;;  %14 = sbr.rel (!%p12_p3) target bundleno = 3 (0x3), region = 63 }
 0x13f   :  { %320 = vsyncpa [#allocation3], 1 }
 0x140   :  { %322 = vsyncpa [#allocation3 + $0x1], 1 }

</bundles_post_ra>
